<compile_context>
chip_gen: v7x
topology: tpu7x:2x2x1
jax: 0.10.0
libtpu: 0.0.40
codegen_flags: <defaults>
</compile_context>

<pallas_src>
import functools

import jax
import jax.numpy as jnp
from jax.experimental import pallas as pl
from jax.experimental.pallas import tpu as pltpu


# Packed-parameter flat layout (f32 scalars in SMEM):
#   [ 0.. 5] w1 (2,3) row-major : w1[j,i] -> 3*j + i
#   [ 6.. 7] b1 (2,)
#   [ 8..11] w2 (2,2) row-major : w2[j,i] -> 8 + 2*j + i
#   [12..13] b2 (2,)
#   [14..19] w3 (3,2) row-major : w3[j,i] -> 14 + 2*j + i
#   [20..22] b3 (3,)
_W1, _B1, _W2, _B2, _W3, _B3 = 0, 6, 8, 12, 14, 20
_N_PARAMS = 23

# Default max lanes per batch tile: 128K lanes -> block = 3*tb*4 B = 1.5 MiB,
# total VMEM footprint ~ 4x block = 6 MiB (fits default scoped VMEM on
# v5e/v6e/v7x without touching vmem_limit_bytes).
_TB_DEFAULT = 128 * 1024


def _cdiv(a, b):
    return -(-a // b)


def _round_up(v, m):
    return _cdiv(v, m) * m


def mlp_kernel(p_ref, x_ref, o_ref):
    # x_ref / o_ref: (3, R, 128) blocks -> each feature is a dense (R, 128)
    # sublane/lane tile; every VPU op and every store is full-width.
    # Read all 23 scalars from SMEM exactly once.
    p = [p_ref[i] for i in range(_N_PARAMS)]
    w1 = lambda j, i: p[_W1 + 3 * j + i]
    b1 = lambda j: p[_B1 + j]
    w2 = lambda j, i: p[_W2 + 2 * j + i]
    b2 = lambda j: p[_B2 + j]
    w3 = lambda j, i: p[_W3 + 2 * j + i]
    b3 = lambda j: p[_B3 + j]

    x0 = x_ref[0]
    x1 = x_ref[1]
    x2 = x_ref[2]

    # linear1 + relu: h1_j = relu(sum_i w1[j,i]*x_i + b1[j])   (pure VPU)
    h1_0 = jnp.maximum(w1(0, 0) * x0 + w1(0, 1) * x1 + w1(0, 2) * x2 + b1(0), 0.0)
    h1_1 = jnp.maximum(w1(1, 0) * x0 + w1(1, 1) * x1 + w1(1, 2) * x2 + b1(1), 0.0)

    # linear2 + relu
    h2_0 = jnp.maximum(w2(0, 0) * h1_0 + w2(0, 1) * h1_1 + b2(0), 0.0)
    h2_1 = jnp.maximum(w2(1, 0) * h1_0 + w2(1, 1) * h1_1 + b2(1), 0.0)

    # linear3 (no activation); each store is a full dense (R, 128) tile.
    o_ref[0] = w3(0, 0) * h2_0 + w3(0, 1) * h2_1 + b3(0)
    o_ref[1] = w3(1, 0) * h2_0 + w3(1, 1) * h2_1 + b3(1)
    o_ref[2] = w3(2, 0) * h2_0 + w3(2, 1) * h2_1 + b3(2)


def pack_params(params):
    return jnp.concatenate([
        params["w1"].reshape(-1), params["b1"],
        params["w2"].reshape(-1), params["b2"],
        params["w3"].reshape(-1), params["b3"],
    ]).astype(jnp.float32)


def _forward_feature_major(xt, p_flat, tb):
    """Core: xt is feature-major (3, N) f32. Returns (3, N) f32."""
    N = xt.shape[1]

    # --- derive tiling (all static, from shapes) ------------------------
    R_total = _cdiv(N, 128)           # total 128-lane columns of the batch
    R_max = max(1, tb // 128)         # max sublane-rows per block
    n = _cdiv(R_total, R_max)         # grid steps
    if n == 1 and R_total >= 32:
        n = 2                          # keep >=2 steps -> both TCs on v7x
    if n == 1:
        R_block = R_total              # block == full dim (allowed even if <8)
        R_pad = R_total
    else:
        # even split, sublane dim a multiple of 8; padding waste < R_block*128
        R_block = _round_up(_cdiv(R_total, n), 8)
        R_pad = _round_up(R_total, R_block)
        n = R_pad // R_block
    b_pad = R_pad * 128

    xt_p = jnp.pad(xt, ((0, 0), (0, b_pad - N)))     # (3, b_pad)
    x3 = xt_p.reshape(3, R_pad, 128)                  # free reshape (contiguous)

    out3 = pl.pallas_call(
        mlp_kernel,
        out_shape=jax.ShapeDtypeStruct((3, R_pad, 128), jnp.float32),
        grid=(n,),
        in_specs=[
            pl.BlockSpec(memory_space=pltpu.MemorySpace.SMEM),     # packed params
            pl.BlockSpec((3, R_block, 128), lambda i: (0, i, 0)),  # x tile
        ],
        out_specs=pl.BlockSpec((3, R_block, 128), lambda i: (0, i, 0)),
        compiler_params=pltpu.CompilerParams(
            dimension_semantics=("parallel",)),  # shards over 2 TCs on v7x
    )(p_flat, x3)

    return out3.reshape(3, b_pad)[:, :N]   # slice BEFORE any transpose


@functools.partial(jax.jit, static_argnames=("tb",))
def mlp_forward_feature_major(xt, params, *, tb=_TB_DEFAULT):
    """Feature-major entry point: xt (3, N) f32 -> (3, N) f32.
    No transpose plumbing; preferred if the caller can keep data feature-major."""
    return _forward_feature_major(xt.astype(jnp.float32), pack_params(params), tb)


@functools.partial(jax.jit, static_argnames=("tb",))
def mlp_forward(x, params, *, tb=_TB_DEFAULT):
    """PyTorch contract: x (B, 3) f32 -> (B, 3) f32.

    NOTE: honoring the (B, 3) layout costs one transpose in and one
    slice-then-transpose out -- two full-array HBM round trips outside the
    pallas_call that cannot fuse into it.  Use mlp_forward_feature_major to
    avoid them when possible.
    """
    xt = x.astype(jnp.float32).T                      # (3, B)
    out_t = _forward_feature_major(xt, pack_params(params), tb)
    return out_t.T                                    # (B, 3)


def init_params(key):
    """Deterministic init; shapes follow nn.Linear(in, out) -> weight (out, in)."""
    ks = jax.random.split(key, 6)

    def linear_init(kw, kb, fan_in, fan_out):
        bound = 1.0 / jnp.sqrt(jnp.float32(fan_in))
        w = jax.random.uniform(kw, (fan_out, fan_in), jnp.float32, -bound, bound)
        b = jax.random.uniform(kb, (fan_out,), jnp.float32, -bound, bound)
        return w, b

    w1, b1 = linear_init(ks[0], ks[1], 3, 2)
    w2, b2 = linear_init(ks[2], ks[3], 2, 2)
    w3, b3 = linear_init(ks[4], ks[5], 2, 3)
    return {"w1": w1, "b1": b1, "w2": w2, "b2": b2, "w3": w3, "b3": b3}


def mlp_reference(x, p):
    h1 = jnp.maximum(x @ p["w1"].T + p["b1"], 0.0)
    h2 = jnp.maximum(h1 @ p["w2"].T + p["b2"], 0.0)
    return h2 @ p["w3"].T + p["b3"]


if __name__ == "__main__":
    key = jax.random.PRNGKey(0)
    k_param, k_x, k_x2 = jax.random.split(key, 3)

    params = init_params(k_param)

    # Small primary check (batch=8, features=3) -- single-tile path.
    x = jax.random.normal(k_x, (8, 3), jnp.float32)
    out = jax.block_until_ready(mlp_forward(x, params))
    ref = mlp_reference(x, params)
    assert out.shape == (8, 3)
    assert jnp.allclose(out, ref, atol=1e-5, rtol=1e-5), "mismatch (B=8)"

    # Secondary check exercising the multi-tile (grid >= 2) + padding path.
    x2 = jax.random.normal(k_x2, (5000, 3), jnp.float32)
    out2 = jax.block_until_ready(mlp_forward(x2, params))
    ref2 = mlp_reference(x2, params)
    assert out2.shape == (5000, 3)
    assert jnp.allclose(out2, ref2, atol=1e-5, rtol=1e-5), "mismatch (B=5000)"

    print("KERNEL_OK")
</pallas_src>

<mosaic_0001>
module attributes {stable_mosaic.version = 11 : i64} {
  func.func @mlp_kernel(%arg0: i32, %arg1: memref<23xf32, #tpu.memory_space<smem>>, %arg2: memref<3x1x128xf32, #tpu.memory_space<vmem>>, %arg3: memref<3x1x128xf32, #tpu.memory_space<vmem>>) attributes {dimension_semantics = [#tpu.dimension_semantics<parallel>], iteration_bounds = array<i64: 1>, scalar_prefetch = 0 : i64, scratch_operands = 0 : i64, tpu.core_type = #tpu.core_type<tc>, window_params = [{transform_indices = @transform_0, window_bounds = array<i64: 23>}, {transform_indices = @transform_1, window_bounds = array<i64: 3, 1, 128>}, {transform_indices = @transform_2, window_bounds = array<i64: 3, 1, 128>}]} {
    %c0 = arith.constant 0 : index
    %0 = memref.load %arg1[%c0] : memref<23xf32, #tpu.memory_space<smem>>
    %c1 = arith.constant 1 : index
    %1 = memref.load %arg1[%c1] : memref<23xf32, #tpu.memory_space<smem>>
    %c2 = arith.constant 2 : index
    %2 = memref.load %arg1[%c2] : memref<23xf32, #tpu.memory_space<smem>>
    %c3 = arith.constant 3 : index
    %3 = memref.load %arg1[%c3] : memref<23xf32, #tpu.memory_space<smem>>
    %c4 = arith.constant 4 : index
    %4 = memref.load %arg1[%c4] : memref<23xf32, #tpu.memory_space<smem>>
    %c5 = arith.constant 5 : index
    %5 = memref.load %arg1[%c5] : memref<23xf32, #tpu.memory_space<smem>>
    %c6 = arith.constant 6 : index
    %6 = memref.load %arg1[%c6] : memref<23xf32, #tpu.memory_space<smem>>
    %c7 = arith.constant 7 : index
    %7 = memref.load %arg1[%c7] : memref<23xf32, #tpu.memory_space<smem>>
    %c8 = arith.constant 8 : index
    %8 = memref.load %arg1[%c8] : memref<23xf32, #tpu.memory_space<smem>>
    %c9 = arith.constant 9 : index
    %9 = memref.load %arg1[%c9] : memref<23xf32, #tpu.memory_space<smem>>
    %c10 = arith.constant 10 : index
    %10 = memref.load %arg1[%c10] : memref<23xf32, #tpu.memory_space<smem>>
    %c11 = arith.constant 11 : index
    %11 = memref.load %arg1[%c11] : memref<23xf32, #tpu.memory_space<smem>>
    %c12 = arith.constant 12 : index
    %12 = memref.load %arg1[%c12] : memref<23xf32, #tpu.memory_space<smem>>
    %c13 = arith.constant 13 : index
    %13 = memref.load %arg1[%c13] : memref<23xf32, #tpu.memory_space<smem>>
    %c14 = arith.constant 14 : index
    %14 = memref.load %arg1[%c14] : memref<23xf32, #tpu.memory_space<smem>>
    %c15 = arith.constant 15 : index
    %15 = memref.load %arg1[%c15] : memref<23xf32, #tpu.memory_space<smem>>
    %c16 = arith.constant 16 : index
    %16 = memref.load %arg1[%c16] : memref<23xf32, #tpu.memory_space<smem>>
    %c17 = arith.constant 17 : index
    %17 = memref.load %arg1[%c17] : memref<23xf32, #tpu.memory_space<smem>>
    %c18 = arith.constant 18 : index
    %18 = memref.load %arg1[%c18] : memref<23xf32, #tpu.memory_space<smem>>
    %c19 = arith.constant 19 : index
    %19 = memref.load %arg1[%c19] : memref<23xf32, #tpu.memory_space<smem>>
    %c20 = arith.constant 20 : index
    %20 = memref.load %arg1[%c20] : memref<23xf32, #tpu.memory_space<smem>>
    %c21 = arith.constant 21 : index
    %21 = memref.load %arg1[%c21] : memref<23xf32, #tpu.memory_space<smem>>
    %c22 = arith.constant 22 : index
    %22 = memref.load %arg1[%c22] : memref<23xf32, #tpu.memory_space<smem>>
    %c0_0 = arith.constant 0 : index
    %c0_1 = arith.constant 0 : index
    %c0_2 = arith.constant 0 : index
    %23 = vector.load %arg2[%c0_0, %c0_1, %c0_2] : memref<3x1x128xf32, #tpu.memory_space<vmem>>, vector<1x1x128xf32>
    %24 = vector.shape_cast %23 : vector<1x1x128xf32> to vector<1x128xf32>
    %c1_3 = arith.constant 1 : index
    %c0_4 = arith.constant 0 : index
    %c0_5 = arith.constant 0 : index
    %25 = vector.load %arg2[%c1_3, %c0_4, %c0_5] : memref<3x1x128xf32, #tpu.memory_space<vmem>>, vector<1x1x128xf32>
    %26 = vector.shape_cast %25 : vector<1x1x128xf32> to vector<1x128xf32>
    %c2_6 = arith.constant 2 : index
    %c0_7 = arith.constant 0 : index
    %c0_8 = arith.constant 0 : index
    %27 = vector.load %arg2[%c2_6, %c0_7, %c0_8] : memref<3x1x128xf32, #tpu.memory_space<vmem>>, vector<1x1x128xf32>
    %28 = vector.shape_cast %27 : vector<1x1x128xf32> to vector<1x128xf32>
    %29 = vector.broadcast %0 : f32 to vector<1x128xf32>
    %30 = arith.mulf %29, %24 : vector<1x128xf32>
    %31 = vector.broadcast %1 : f32 to vector<1x128xf32>
    %32 = arith.mulf %31, %26 : vector<1x128xf32>
    %33 = arith.addf %30, %32 : vector<1x128xf32>
    %34 = vector.broadcast %2 : f32 to vector<1x128xf32>
    %35 = arith.mulf %34, %28 : vector<1x128xf32>
    %36 = arith.addf %33, %35 : vector<1x128xf32>
    %37 = vector.broadcast %6 : f32 to vector<1x128xf32>
    %38 = arith.addf %36, %37 : vector<1x128xf32>
    %cst = arith.constant 0.000000e+00 : f32
    %39 = vector.broadcast %cst : f32 to vector<1x128xf32>
    %40 = arith.maximumf %38, %39 : vector<1x128xf32>
    %41 = vector.broadcast %3 : f32 to vector<1x128xf32>
    %42 = arith.mulf %41, %24 : vector<1x128xf32>
    %43 = vector.broadcast %4 : f32 to vector<1x128xf32>
    %44 = arith.mulf %43, %26 : vector<1x128xf32>
    %45 = arith.addf %42, %44 : vector<1x128xf32>
    %46 = vector.broadcast %5 : f32 to vector<1x128xf32>
    %47 = arith.mulf %46, %28 : vector<1x128xf32>
    %48 = arith.addf %45, %47 : vector<1x128xf32>
    %49 = vector.broadcast %7 : f32 to vector<1x128xf32>
    %50 = arith.addf %48, %49 : vector<1x128xf32>
    %cst_9 = arith.constant 0.000000e+00 : f32
    %51 = vector.broadcast %cst_9 : f32 to vector<1x128xf32>
    %52 = arith.maximumf %50, %51 : vector<1x128xf32>
    %53 = vector.broadcast %8 : f32 to vector<1x128xf32>
    %54 = arith.mulf %53, %40 : vector<1x128xf32>
    %55 = vector.broadcast %9 : f32 to vector<1x128xf32>
    %56 = arith.mulf %55, %52 : vector<1x128xf32>
    %57 = arith.addf %54, %56 : vector<1x128xf32>
    %58 = vector.broadcast %12 : f32 to vector<1x128xf32>
    %59 = arith.addf %57, %58 : vector<1x128xf32>
    %cst_10 = arith.constant 0.000000e+00 : f32
    %60 = vector.broadcast %cst_10 : f32 to vector<1x128xf32>
    %61 = arith.maximumf %59, %60 : vector<1x128xf32>
    %62 = vector.broadcast %10 : f32 to vector<1x128xf32>
    %63 = arith.mulf %62, %40 : vector<1x128xf32>
    %64 = vector.broadcast %11 : f32 to vector<1x128xf32>
    %65 = arith.mulf %64, %52 : vector<1x128xf32>
    %66 = arith.addf %63, %65 : vector<1x128xf32>
    %67 = vector.broadcast %13 : f32 to vector<1x128xf32>
    %68 = arith.addf %66, %67 : vector<1x128xf32>
    %cst_11 = arith.constant 0.000000e+00 : f32
    %69 = vector.broadcast %cst_11 : f32 to vector<1x128xf32>
    %70 = arith.maximumf %68, %69 : vector<1x128xf32>
    %71 = vector.broadcast %14 : f32 to vector<1x128xf32>
    %72 = arith.mulf %71, %61 : vector<1x128xf32>
    %73 = vector.broadcast %15 : f32 to vector<1x128xf32>
    %74 = arith.mulf %73, %70 : vector<1x128xf32>
    %75 = arith.addf %72, %74 : vector<1x128xf32>
    %76 = vector.broadcast %20 : f32 to vector<1x128xf32>
    %77 = arith.addf %75, %76 : vector<1x128xf32>
    %c0_12 = arith.constant 0 : index
    %c0_13 = arith.constant 0 : index
    %c0_14 = arith.constant 0 : index
    %78 = vector.load %arg3[%c0_12, %c0_13, %c0_14] : memref<3x1x128xf32, #tpu.memory_space<vmem>>, vector<1x1x128xf32>
    %79 = vector.shape_cast %78 : vector<1x1x128xf32> to vector<1x128xf32>
    %80 = vector.shape_cast %77 : vector<1x128xf32> to vector<1x1x128xf32>
    tpu.vector_store %arg3[%c0_12, %c0_13, %c0_14], %80 {strides = array<i32>} : memref<3x1x128xf32, #tpu.memory_space<vmem>>, vector<1x1x128xf32>,
    %81 = vector.broadcast %16 : f32 to vector<1x128xf32>
    %82 = arith.mulf %81, %61 : vector<1x128xf32>
    %83 = vector.broadcast %17 : f32 to vector<1x128xf32>
    %84 = arith.mulf %83, %70 : vector<1x128xf32>
    %85 = arith.addf %82, %84 : vector<1x128xf32>
    %86 = vector.broadcast %21 : f32 to vector<1x128xf32>
    %87 = arith.addf %85, %86 : vector<1x128xf32>
    %c1_15 = arith.constant 1 : index
    %c0_16 = arith.constant 0 : index
    %c0_17 = arith.constant 0 : index
    %88 = vector.load %arg3[%c1_15, %c0_16, %c0_17] : memref<3x1x128xf32, #tpu.memory_space<vmem>>, vector<1x1x128xf32>
    %89 = vector.shape_cast %88 : vector<1x1x128xf32> to vector<1x128xf32>
    %90 = vector.shape_cast %87 : vector<1x128xf32> to vector<1x1x128xf32>
    tpu.vector_store %arg3[%c1_15, %c0_16, %c0_17], %90 {strides = array<i32>} : memref<3x1x128xf32, #tpu.memory_space<vmem>>, vector<1x1x128xf32>,
    %91 = vector.broadcast %18 : f32 to vector<1x128xf32>
    %92 = arith.mulf %91, %61 : vector<1x128xf32>
    %93 = vector.broadcast %19 : f32 to vector<1x128xf32>
    %94 = arith.mulf %93, %70 : vector<1x128xf32>
    %95 = arith.addf %92, %94 : vector<1x128xf32>
    %96 = vector.broadcast %22 : f32 to vector<1x128xf32>
    %97 = arith.addf %95, %96 : vector<1x128xf32>
    %c2_18 = arith.constant 2 : index
    %c0_19 = arith.constant 0 : index
    %c0_20 = arith.constant 0 : index
    %98 = vector.load %arg3[%c2_18, %c0_19, %c0_20] : memref<3x1x128xf32, #tpu.memory_space<vmem>>, vector<1x1x128xf32>
    %99 = vector.shape_cast %98 : vector<1x1x128xf32> to vector<1x128xf32>
    %100 = vector.shape_cast %97 : vector<1x128xf32> to vector<1x1x128xf32>
    tpu.vector_store %arg3[%c2_18, %c0_19, %c0_20], %100 {strides = array<i32>} : memref<3x1x128xf32, #tpu.memory_space<vmem>>, vector<1x1x128xf32>,
    return
  }
  func.func @transform_0(%arg0: i32) -> i32 {
    %c0_i32 = arith.constant 0 : i32
    %c0_i32_0 = arith.constant 0 : i32
    return %c0_i32 : i32
  }
  func.func @transform_1(%arg0: i32) -> (i32, i32, i32) {
    %c0_i32 = arith.constant 0 : i32
    %c0_i32_0 = arith.constant 0 : i32
    %c0_i32_1 = arith.constant 0 : i32
    return %c0_i32, %arg0, %c0_i32_0 : i32, i32, i32
  }
  func.func @transform_2(%arg0: i32) -> (i32, i32, i32) {
    %c0_i32 = arith.constant 0 : i32
    %c0_i32_0 = arith.constant 0 : i32
    %c0_i32_1 = arith.constant 0 : i32
    return %c0_i32, %arg0, %c0_i32_0 : i32, i32, i32
  }
}

</mosaic_0001>

<bundles_post_ra>
// kernel: mlp_forward.1
= control target key start
LH: loop header
LB: loop body
LE: loop exit
PB: predicated region body
PF: predicated region fallthrough
CT: control target
= control target key end

     0   :  { %7 = vsyncpa [#allocation3], 0  ;;  %s220_s0 = inlined_call_operand.vmem [shape: f32[23], index: 0, kind: input, shape index: {}]   ;;  %s221_s1 = inlined_call_operand.vmem [shape: f32[3,1,128], index: 1, kind: input, shape index: {}]   ;;  %s222_s2 = inlined_call_operand.vmem [shape: f32[3,1,128], index: 2, kind: output, shape index: {}]  }
   0x1   :  { %s14_s11 = sshll.u32 %s220_s0, 4  ;;  %s15_s11 = int_to_ptr.vmem [resolvable:$true] %s14_s11 }
   0x2   :  { %s148_s12 = scalar_lea.vmem %s15_s11, 16  ;;  %p153_p1 = scmp.lt.s32.totalorder %s15_s11, %s15_s11 }
   0x3   :  { %p149_p0 = scmp.ne.s32.totalorder %s15_s11, %s148_s12  ;;  %p154_p2 = scmp.lt.s32.totalorder %s148_s12, %s148_s12 }
   0x5   :  { %p155_p3 = por %p154_p2, %p153_p1 }
   0x7   :  { %p156_p4 = pnand %p155_p3, %p149_p0 }
   0x9   :  { %159 = shalt.err (!%p156_p4)
}
   0xa   :  { %s162_s13 = smov [#allocation2]  }
   0xb   :  { %17 = dma.vmem_to_smem %s15_s11, 16, %s162_s13, [#allocation3]  }
   0xc   :  { %160 = dma.done.wait [#allocation3], 16  }
   0xd   :  { %161 = vsyncadd [#allocation3], 4294967280 }
   0xe   :  { %23 = sfence }
   0xf   :  { %s24_s14 = sld [smem:[#allocation2]]  ;;  %s121_s15 = sld [smem:[#allocation2 + $0x1]]  ;;  %v47_v0 = vld [vmem:[%s221_s1] sm:$0x1]  ;;  %v143_v1 = vld [vmem:[%s221_s1 + $0x1] sm:$0x1] }
  0x10   :  { %s122_s16 = sld [smem:[#allocation2 + $0x2]]  ;;  %s123_s17 = sld [smem:[#allocation2 + $0x3]]  ;;  %v144_v2 = vld [vmem:[%s221_s1 + $0x2] sm:$0x1] }
  0x11   :  { %s124_s18 = sld [smem:[#allocation2 + $0x4]]  ;;  %s125_s19 = sld [smem:[#allocation2 + $0x5]] }
  0x12   :  { %s126_s0 = sld [smem:[#allocation2 + $0x6]]  ;;  %s181_s20 = sld [smem:[#allocation2 + $0x7]] }
  0x13   :  { %s192_s27 = sld [smem:[#allocation2 + $0x8]]  ;;  %s194_s28 = sld [smem:[#allocation2 + $0xa]] }
  0x14   :  { %s196_s29 = sld [smem:[#allocation2 + $0x9]]  ;;  %s198_s30 = sld [smem:[#allocation2 + $0xb]] }
  0x15   :  { %v52_v3 = vstv %s24_s14  ;;  %v54_v4 = vstv %s121_s15  ;;  %s132_s1 = sld [smem:[#allocation2 + $0xc]]  ;;  %s133_s3 = sld [smem:[#allocation2 + $0xd]] }
  0x16   :  { %v53_v5 = vmul.f32 %v52_v3, %v47_v0  ;;  %v55_v6 = vmul.f32 %v143_v1, %v54_v4  ;;  %v57_v7 = vstv %s122_s16  ;;  %v63_v8 = vstv %s123_s17  ;;  %s203_s4 = sld [smem:[#allocation2 + $0xe]]  ;;  %s205_s5 = sld [smem:[#allocation2 + $0xf]] }
  0x17   :  { %v58_v9 = vmul.f32 %v144_v2, %v57_v7  ;;  %v64_v10 = vmul.f32 %v63_v8, %v47_v0  ;;  %v65_v11 = vstv %s124_s18  ;;  %v68_v12 = vstv %s125_s19  ;;  %s136_s6 = sld [smem:[#allocation2 + $0x10]]  ;;  %s137_s7 = sld [smem:[#allocation2 + $0x11]] }
  0x18   :  { %v56_v13 = vadd.f32 %v55_v6, %v53_v5  ;;  %v66_v14 = vmul.f32 %v143_v1, %v65_v11  ;;  %v69_v15 = vmul.f32 %v144_v2, %v68_v12  ;;  %v60_v16 = vstv %s126_s0  ;;  %s138_s8 = sld [smem:[#allocation2 + $0x12]]  ;;  %s139_s9 = sld [smem:[#allocation2 + $0x13]] }
  0x19   :  { %v71_v19 = vstv %s181_s20  ;;  %v74_v22 = vstv %s192_s27  ;;  %v82_v23 = vstv %s194_s28  ;;  %s140_s10 = sld [smem:[#allocation2 + $0x14]]  ;;  %s141_s11 = sld [smem:[#allocation2 + $0x15]] }
  0x1a   :  { %v59_v17 = vadd.f32 %v58_v9, %v56_v13  ;;  %v67_v18 = vadd.f32 %v66_v14, %v64_v10  ;;  %v76_v26 = vstv %s196_s29  ;;  %v84_v27 = vstv %s198_s30  ;;  %s142_s12 = sld [smem:[#allocation2 + $0x16]] }
  0x1b   :  { %v79_v33 = vstv %s132_s1  ;;  %v87_v34 = vstv %s133_s3 }
  0x1c   :  { %v61_v20 = vadd.f32 %v60_v16, %v59_v17  ;;  %v70_v21 = vadd.f32 %v69_v15, %v67_v18  ;;  %v90_v39 = vstv %s203_s4  ;;  %v92_v40 = vstv %s205_s5 }
  0x1d   :  { %v98_v41 = vstv %s136_s6  ;;  %v100_v42 = vstv %s137_s7 }
  0x1e   :  { %v62_v24 = vmax.f32 %v61_v20, 0.0  ;;  %v72_v25 = vadd.f32 %v71_v19, %v70_v21  ;;  %v107_v45 = vstv %s138_s8  ;;  %v109_v46 = vstv %s139_s9 }
  0x1f   :  { %v95_v51 = vstv %s140_s10  ;;  %v103_v52 = vstv %s141_s11 }
  0x20   :  { %v73_v28 = vmax.f32 %v72_v25, 0.0  ;;  %v75_v29 = vmul.f32 %v74_v22, %v62_v24  ;;  %v83_v30 = vmul.f32 %v82_v23, %v62_v24  ;;  %v112_v57 = vstv %s142_s12 }
  0x22   :  { %v77_v31 = vmul.f32 %v76_v26, %v73_v28  ;;  %v85_v32 = vmul.f32 %v84_v27, %v73_v28 }
  0x24   :  { %v78_v35 = vadd.f32 %v77_v31, %v75_v29  ;;  %v86_v36 = vadd.f32 %v85_v32, %v83_v30 }
  0x26   :  { %v80_v37 = vadd.f32 %v79_v33, %v78_v35  ;;  %v88_v38 = vadd.f32 %v87_v34, %v86_v36 }
  0x28   :  { %v81_v43 = vmax.f32 %v80_v37, 0.0  ;;  %v89_v44 = vmax.f32 %v88_v38, 0.0 }
  0x2a   :  { %v91_v47 = vmul.f32 %v90_v39, %v81_v43  ;;  %v93_v48 = vmul.f32 %v92_v40, %v89_v44  ;;  %v99_v49 = vmul.f32 %v98_v41, %v81_v43  ;;  %v101_v50 = vmul.f32 %v100_v42, %v89_v44 }
  0x2b   :  { %v108_v53 = vmul.f32 %v107_v45, %v81_v43  ;;  %v110_v54 = vmul.f32 %v109_v46, %v89_v44 }
  0x2c   :  { %v94_v55 = vadd.f32 %v93_v48, %v91_v47  ;;  %v102_v56 = vadd.f32 %v101_v50, %v99_v49 }
  0x2d   :  { %v111_v58 = vadd.f32 %v110_v54, %v108_v53 }
  0x2e   :  { %v96_v59 = vadd.f32 %v95_v51, %v94_v55  ;;  %v104_v60 = vadd.f32 %v103_v52, %v102_v56 }
  0x2f   :  { %v113_v61 = vadd.f32 %v112_v57, %v111_v58 }
  0x30   :  { %97 = vst [vmem:[%s222_s2] sm:$0x1] %v96_v59  ;;  %145 = vst [vmem:[%s222_s2 + $0x1] sm:$0x1] %v104_v60 }
  0x31   :  { %146 = vst [vmem:[%s222_s2 + $0x2] sm:$0x1] %v113_v61 }
  0x32   :  { %120 = vsyncpa [#allocation3], 1 }

</bundles_post_ra>
